<compile_context>
chip_gen: v7x
topology: tpu7x:2x2x1
jax: 0.10.0
libtpu: 0.0.40
codegen_flags: <defaults>
</compile_context>

<pallas_src>
import math

import jax
import jax.numpy as jnp
from jax import lax
from jax.experimental import pallas as pl
from jax.experimental.pallas import tpu as pltpu


def _erf(z):
    # Abramowitz & Stegun 7.1.26 (|err| <= 1.5e-7), built only from ops with
    # guaranteed Mosaic lowerings (abs/mul/add/div/exp/where); exp hits the EUP.
    p = 0.3275911
    a1, a2, a3, a4, a5 = (0.254829592, -0.284496736, 1.421413741,
                          -1.453152027, 1.061405429)
    az = jnp.abs(z)
    t = 1.0 / (1.0 + p * az)
    poly = ((((a5 * t + a4) * t + a3) * t + a2) * t + a1) * t
    pos = 1.0 - poly * jnp.exp(-(az * az))
    return jnp.where(z < 0, -pos, pos)


def _se_kernel(x_ref, w1_ref, w2_ref, o_ref):
    # x_ref/o_ref: (Bt, C, HW); w1_ref: (C, Cr); w2_ref: (Cr, C)
    x = x_ref[...]                                   # native dtype (bf16 stays bf16)
    bt, c, hw = x.shape
    inv_hw = 1.0 / hw

    # --- squeeze: global average pool over the spatial (lane) axis, f32 result.
    if x.dtype == jnp.float32:
        # f32 input: plain lane reduce — exact, and the "f32 upcast" is a no-op.
        y = jnp.sum(x, axis=-1) * inv_hw                                  # (Bt, C)
    else:
        # bf16/f16 input: row-sum on the MXU (native low-precision operands with
        # f32 accumulation) — avoids materializing a full-slab f32 upcast temp
        # and moves the reduce off the VPU/XLU into an otherwise idle MXU slot.
        ones = jnp.ones((hw, 1), dtype=x.dtype)
        y = jnp.dot(x.reshape(bt * c, hw), ones,
                    preferred_element_type=jnp.float32)                   # (Bt*C, 1)
        y = y.reshape(bt, c) * inv_hw                                     # (Bt, C)

    # --- excitation: Linear -> exact GELU(erf) -> Linear -> Sigmoid.
    # Tiny (Bt x C x C/r) matmuls; HIGHEST precision keeps true-f32 accuracy on
    # the MXU at negligible cost (the kernel is HBM-bound regardless).  Weights
    # are used as given (no per-step cast); mixed dtypes promote once, cheaply.
    h = jnp.dot(y, w1_ref[...], preferred_element_type=jnp.float32,
                precision=lax.Precision.HIGHEST)                          # (Bt, Cr)
    h = 0.5 * h * (1.0 + _erf(h * (1.0 / math.sqrt(2.0))))                # exact GELU
    s = jnp.dot(h, w2_ref[...], preferred_element_type=jnp.float32,
                precision=lax.Precision.HIGHEST)                          # (Bt, C)
    s = jax.nn.sigmoid(s)

    # --- scale: broadcast s along lanes; multiply in the input dtype (halves
    # VALU/ld-st work for bf16 on v6e/v7x; on v5e it is widened anyway).
    s = s.astype(x.dtype)[:, :, None]                                     # (Bt, C, 1)
    o_ref[...] = (x * s).astype(o_ref.dtype)


def _vmem_ceiling_bytes():
    """~75% of this chip's per-core VMEM (v7x: 48 MiB, v5e/v6e: 96 MiB) so Mosaic
    keeps headroom for internal scratch; conservative v7x-safe fallback."""
    try:
        cap = int(pltpu.get_tpu_info().vmem_capacity_bytes)
        if cap > 0:
            return (cap * 3) // 4
    except Exception:
        pass
    return 48 << 20


def _choose_batch_tile(B, per_batch_bytes, block_budget_bytes, min_steps):
    """Largest Bt whose (padded) block fits the byte budget while keeping at
    least `min_steps` grid steps when B allows it, so BlockSpec double-buffering
    has work to overlap and both v7x TensorCores get >= 2 steps each."""
    max_bt = max(1, block_budget_bytes // max(per_batch_bytes, 1))
    bt = max(1, min(B, max_bt))
    want_steps = max(1, min(min_steps, B))
    bt = min(bt, max(1, pl.cdiv(B, want_steps)))
    return int(bt)


def se_layer_pallas(x_nchw, w1, w2, *, target_block_bytes=8 << 20, min_grid_steps=4):
    """x_nchw: (B, C, H, W); w1: (C, Cr); w2: (Cr, C) (transposed from PyTorch's
    (out, in) Linear layout so the kernel computes y @ W).  Returns (B, C, H, W)."""
    B, C, H, W = x_nchw.shape
    Cr = w1.shape[1]
    assert w1.shape == (C, Cr) and w2.shape == (Cr, C)
    HW = H * W
    itemsize = jnp.dtype(x_nchw.dtype).itemsize

    # NCHW -> (B, C, HW): pure reshape of contiguous memory, no HBM transpose.
    x = x_nchw.reshape(B, C, HW)

    # Per-batch VMEM footprint with (sublane=8, lane=128) padding so non-multiple
    # spatial sizes are budgeted correctly.
    padded_c = -(-C // 8) * 8
    padded_hw = -(-HW // 128) * 128
    per_batch_bytes = padded_c * padded_hw * itemsize

    w_bytes = (w1.size * jnp.dtype(w1.dtype).itemsize
               + w2.size * jnp.dtype(w2.dtype).itemsize)
    slack = 4 << 20                      # Mosaic internal scratch + small temps

    # VMEM model per grid step: in + out double-buffered (4x block) plus ~2
    # block-sized in-kernel temporaries (broadcast scale / product), weights, slack.
    vmem_ceiling = _vmem_ceiling_bytes()
    max_block_bytes = max(per_batch_bytes,
                          (vmem_ceiling - 2 * w_bytes - slack) // 6)
    block_budget = min(target_block_bytes, max_block_bytes)

    Bt = _choose_batch_tile(B, per_batch_bytes, block_budget, min_grid_steps)
    grid = (pl.cdiv(B, Bt),)             # ragged last block is clipped on writeback

    block_bytes = Bt * per_batch_bytes
    vmem_need = 6 * block_bytes + 2 * w_bytes + slack
    # TODO(synk): add an HW-tiled two-pass fallback (partial sums + excitation,
    # then scale) for feature maps where a single batch element exceeds the
    # per-core VMEM budget (can happen on v7x's 64 MiB VMEM).
    vmem_limit = int(min(max(vmem_need, 32 << 20), vmem_ceiling))

    out = pl.pallas_call(
        _se_kernel,
        out_shape=jax.ShapeDtypeStruct((B, C, HW), x_nchw.dtype),
        grid_spec=pltpu.PrefetchScalarGridSpec(
            num_scalar_prefetch=0,
            grid=grid,
            in_specs=[
                pl.BlockSpec((Bt, C, HW), lambda b: (b, 0, 0)),
                pl.BlockSpec((C, Cr), lambda b: (0, 0)),   # weights stay resident
                pl.BlockSpec((Cr, C), lambda b: (0, 0)),
            ],
            out_specs=pl.BlockSpec((Bt, C, HW), lambda b: (b, 0, 0)),
        ),
        compiler_params=pltpu.CompilerParams(
            dimension_semantics=("parallel",),
            vmem_limit_bytes=vmem_limit,
        ),
    )(x, w1, w2)

    # (B, C, HW) -> NCHW: free reshape.
    return out.reshape(B, C, H, W)


def se_layer_ref(x_nchw, w1, w2):
    """Pure-JAX reference mirroring the PyTorch module (exact-erf GELU, f32 math)."""
    B, C, H, W = x_nchw.shape
    y = jnp.mean(x_nchw.reshape(B, C, H * W), axis=-1)                    # (B, C)
    h = jnp.dot(y, w1, precision=lax.Precision.HIGHEST)
    h = jax.nn.gelu(h, approximate=False)
    s = jax.nn.sigmoid(jnp.dot(h, w2, precision=lax.Precision.HIGHEST))
    return x_nchw * s[:, :, None, None]


if __name__ == "__main__":
    # Small shapes consistent with the module (reduction=16 -> C must be >= 16).
    B, C, H, W = 2, 64, 16, 16
    reduction = 16
    Cr = C // reduction

    key = jax.random.PRNGKey(0)
    kx, k1, k2 = jax.random.split(key, 3)

    x = jax.random.normal(kx, (B, C, H, W), dtype=jnp.float32)

    # nn.Linear(bias=False) init: U(-1/sqrt(fan_in), +1/sqrt(fan_in)).  PyTorch
    # stores Linear weights as (out, in); we keep the transposed (in, out)
    # layout so the kernel computes y @ W directly.
    bound1 = 1.0 / math.sqrt(C)
    bound2 = 1.0 / math.sqrt(Cr)
    w1 = jax.random.uniform(k1, (C, Cr), jnp.float32, -bound1, bound1)
    w2 = jax.random.uniform(k2, (Cr, C), jnp.float32, -bound2, bound2)

    out = se_layer_pallas(x, w1, w2)
    out = jax.block_until_ready(out)

    ref = se_layer_ref(x, w1, w2)
    assert out.shape == x.shape and out.dtype == x.dtype
    assert jnp.allclose(out, ref, rtol=1e-5, atol=1e-5), \
        float(jnp.max(jnp.abs(out - ref)))

    print("KERNEL_OK")
</pallas_src>

<mosaic_0001>
module attributes {stable_mosaic.version = 11 : i64} {
  func.func @_se_kernel(%arg0: i32, %arg1: memref<1x64x256xf32, #tpu.memory_space<vmem>>, %arg2: memref<64x4xf32, #tpu.memory_space<vmem>>, %arg3: memref<4x64xf32, #tpu.memory_space<vmem>>, %arg4: memref<1x64x256xf32, #tpu.memory_space<vmem>>) attributes {dimension_semantics = [#tpu.dimension_semantics<parallel>], iteration_bounds = array<i64: 2>, scalar_prefetch = 0 : i64, scratch_operands = 0 : i64, tpu.core_type = #tpu.core_type<tc>, window_params = [{transform_indices = @transform_0, window_bounds = array<i64: 1, 64, 256>}, {pipeline_mode = #tpu.pipeline_mode<synchronous>, transform_indices = @transform_1, window_bounds = array<i64: 64, 4>}, {pipeline_mode = #tpu.pipeline_mode<synchronous>, transform_indices = @transform_2, window_bounds = array<i64: 4, 64>}, {transform_indices = @transform_3, window_bounds = array<i64: 1, 64, 256>}]} {
    %c0 = arith.constant 0 : index
    %c0_0 = arith.constant 0 : index
    %c0_1 = arith.constant 0 : index
    %0 = vector.load %arg1[%c0, %c0_0, %c0_1] : memref<1x64x256xf32, #tpu.memory_space<vmem>>, vector<1x64x256xf32>
    %cst = arith.constant dense<0.000000e+00> : vector<1x64xf32>
    %1 = vector.multi_reduction <add>, %0, %cst [2] : vector<1x64x256xf32> to vector<1x64xf32>
    %cst_2 = arith.constant 3.906250e-03 : f32
    %2 = vector.broadcast %cst_2 : f32 to vector<1x64xf32>
    %3 = arith.mulf %1, %2 : vector<1x64xf32>
    %c0_3 = arith.constant 0 : index
    %c0_4 = arith.constant 0 : index
    %4 = vector.load %arg2[%c0_3, %c0_4] : memref<64x4xf32, #tpu.memory_space<vmem>>, vector<64x4xf32>
    %cst_5 = arith.constant dense<0.000000e+00> : vector<1x4xf32>
    %5 = tpu.matmul %3, %4, %cst_5 {dimension_numbers = #tpu.dot_dimension_numbers<[1], [0], [0], [1], [0, 0, 1, 1], [], []>, precision = #tpu.contract_precision<fp32>} : vector<1x64xf32>, vector<64x4xf32>, vector<1x4xf32> -> vector<1x4xf32>
    %cst_6 = arith.constant 5.000000e-01 : f32
    %6 = vector.broadcast %cst_6 : f32 to vector<1x4xf32>
    %7 = arith.mulf %6, %5 : vector<1x4xf32>
    %cst_7 = arith.constant 0.707106769 : f32
    %8 = vector.broadcast %cst_7 : f32 to vector<1x4xf32>
    %9 = arith.mulf %5, %8 : vector<1x4xf32>
    %10 = math.absf %9 : vector<1x4xf32>
    %cst_8 = arith.constant 0.327591091 : f32
    %11 = vector.broadcast %cst_8 : f32 to vector<1x4xf32>
    %12 = arith.mulf %11, %10 : vector<1x4xf32>
    %cst_9 = arith.constant 1.000000e+00 : f32
    %13 = vector.broadcast %cst_9 : f32 to vector<1x4xf32>
    %14 = arith.addf %13, %12 : vector<1x4xf32>
    %cst_10 = arith.constant 1.000000e+00 : f32
    %15 = vector.broadcast %cst_10 : f32 to vector<1x4xf32>
    %16 = arith.divf %15, %14 : vector<1x4xf32>
    %cst_11 = arith.constant 1.06140542 : f32
    %17 = vector.broadcast %cst_11 : f32 to vector<1x4xf32>
    %18 = arith.mulf %17, %16 : vector<1x4xf32>
    %cst_12 = arith.constant -1.45315206 : f32
    %19 = vector.broadcast %cst_12 : f32 to vector<1x4xf32>
    %20 = arith.addf %18, %19 : vector<1x4xf32>
    %21 = arith.mulf %20, %16 : vector<1x4xf32>
    %cst_13 = arith.constant 1.42141378 : f32
    %22 = vector.broadcast %cst_13 : f32 to vector<1x4xf32>
    %23 = arith.addf %21, %22 : vector<1x4xf32>
    %24 = arith.mulf %23, %16 : vector<1x4xf32>
    %cst_14 = arith.constant -0.284496725 : f32
    %25 = vector.broadcast %cst_14 : f32 to vector<1x4xf32>
    %26 = arith.addf %24, %25 : vector<1x4xf32>
    %27 = arith.mulf %26, %16 : vector<1x4xf32>
    %cst_15 = arith.constant 0.254829586 : f32
    %28 = vector.broadcast %cst_15 : f32 to vector<1x4xf32>
    %29 = arith.addf %27, %28 : vector<1x4xf32>
    %30 = arith.mulf %29, %16 : vector<1x4xf32>
    %31 = arith.mulf %10, %10 : vector<1x4xf32>
    %cst_16 = arith.constant 0.000000e+00 : f32
    %32 = vector.broadcast %cst_16 : f32 to vector<1x4xf32>
    %33 = arith.subf %32, %31 : vector<1x4xf32>
    %34 = math.exp %33 : vector<1x4xf32>
    %35 = arith.mulf %30, %34 : vector<1x4xf32>
    %cst_17 = arith.constant 1.000000e+00 : f32
    %36 = vector.broadcast %cst_17 : f32 to vector<1x4xf32>
    %37 = arith.subf %36, %35 : vector<1x4xf32>
    %cst_18 = arith.constant 0.000000e+00 : f32
    %38 = vector.broadcast %cst_18 : f32 to vector<1x4xf32>
    %39 = arith.cmpf olt, %9, %38 : vector<1x4xf32>
    %cst_19 = arith.constant 0.000000e+00 : f32
    %40 = vector.broadcast %cst_19 : f32 to vector<1x4xf32>
    %41 = arith.subf %40, %37 : vector<1x4xf32>
    %42 = arith.select %39, %41, %37 : vector<1x4xi1>, vector<1x4xf32>
    %cst_20 = arith.constant 1.000000e+00 : f32
    %43 = vector.broadcast %cst_20 : f32 to vector<1x4xf32>
    %44 = arith.addf %43, %42 : vector<1x4xf32>
    %45 = arith.mulf %7, %44 : vector<1x4xf32>
    %c0_21 = arith.constant 0 : index
    %c0_22 = arith.constant 0 : index
    %46 = vector.load %arg3[%c0_21, %c0_22] : memref<4x64xf32, #tpu.memory_space<vmem>>, vector<4x64xf32>
    %cst_23 = arith.constant dense<0.000000e+00> : vector<1x64xf32>
    %47 = tpu.matmul %45, %46, %cst_23 {dimension_numbers = #tpu.dot_dimension_numbers<[1], [0], [0], [1], [0, 0, 1, 1], [], []>, precision = #tpu.contract_precision<fp32>} : vector<1x4xf32>, vector<4x64xf32>, vector<1x64xf32> -> vector<1x64xf32>
    %48 = arith.negf %47 : vector<1x64xf32>
    %49 = math.exp %48 : vector<1x64xf32>
    %cst_24 = arith.constant 1.000000e+00 : f32
    %50 = vector.broadcast %cst_24 : f32 to vector<1x64xf32>
    %51 = arith.addf %50, %49 : vector<1x64xf32>
    %52 = arith.divf %50, %51 : vector<1x64xf32>
    %53 = vector.shape_cast %52 : vector<1x64xf32> to vector<1x64x1xf32>
    %54 = vector.broadcast %53 : vector<1x64x1xf32> to vector<1x64x256xf32>
    %55 = arith.mulf %0, %54 : vector<1x64x256xf32>
    %c0_25 = arith.constant 0 : index
    %c0_26 = arith.constant 0 : index
    %c0_27 = arith.constant 0 : index
    %56 = vector.load %arg4[%c0_25, %c0_26, %c0_27] : memref<1x64x256xf32, #tpu.memory_space<vmem>>, vector<1x64x256xf32>
    tpu.vector_store %arg4[%c0_25, %c0_26, %c0_27], %55 {strides = array<i32>} : memref<1x64x256xf32, #tpu.memory_space<vmem>>, vector<1x64x256xf32>,
    return
  }
  func.func @transform_0(%arg0: i32) -> (i32, i32, i32) {
    %c0_i32 = arith.constant 0 : i32
    %c0_i32_0 = arith.constant 0 : i32
    %c0_i32_1 = arith.constant 0 : i32
    return %arg0, %c0_i32, %c0_i32_0 : i32, i32, i32
  }
  func.func @transform_1(%arg0: i32) -> (i32, i32) {
    %c0_i32 = arith.constant 0 : i32
    %c0_i32_0 = arith.constant 0 : i32
    %c0_i32_1 = arith.constant 0 : i32
    return %c0_i32, %c0_i32_0 : i32, i32
  }
  func.func @transform_2(%arg0: i32) -> (i32, i32) {
    %c0_i32 = arith.constant 0 : i32
    %c0_i32_0 = arith.constant 0 : i32
    %c0_i32_1 = arith.constant 0 : i32
    return %c0_i32, %c0_i32_0 : i32, i32
  }
  func.func @transform_3(%arg0: i32) -> (i32, i32, i32) {
    %c0_i32 = arith.constant 0 : i32
    %c0_i32_0 = arith.constant 0 : i32
    %c0_i32_1 = arith.constant 0 : i32
    return %arg0, %c0_i32, %c0_i32_0 : i32, i32, i32
  }
}

</mosaic_0001>

<bundles_post_ra>
// kernel: tpu_custom_call.1
= control target key start
LH: loop header
LB: loop body
LE: loop exit
PB: predicated region body
PF: predicated region fallthrough
CT: control target
= control target key end

     0   :  { %8 = vsyncpa [#allocation3], 0  ;;  %s2408_s0 = inlined_call_operand.hbm [shape: f32[2,64,256], index: 0, kind: input, shape index: {}]   ;;  %s2409_s1 = inlined_call_operand.vmem [shape: f32[64,4], index: 1, kind: input, shape index: {}]   ;;  %s2410_s2 = inlined_call_operand.vmem [shape: f32[4,64], index: 2, kind: input, shape index: {}]   ;;  %s2411_s3 = inlined_call_operand.hbm [shape: f32[2,64,256], index: 3, kind: output, shape index: {}]  }
   0x1   :  { %10 = vsyncpa [#allocation3 + $0x1], 0 }
   0x2   :  { %11 = vsyncpa [#allocation4], 0 }
   0x3   :  { %13 = vsyncpa [#allocation4 + $0x1], 0  ;;  %s1996_s12 = smov 0   ;;  %s1998_s13 = smov 0  }
   0x4   :  { %s2000_s14 = smov 0   ;;  %s2002_s15 = smov 0  }
   0x5 LB: > { %s2017_s16 = sadd.s32 4294967295, %s1965_s15   ;;  %s1490_s17 = sadd.s32 4294967294, %s1965_s15   ;;  %s1965_s15 = sphi %s2002_s15, %s2424_s15   ;;  %s1961_s14 = sphi %s2000_s14, %s2423_s14   ;;  %s1957_s13 = sphi %s1998_s13, %s2422_s13   ;;  %s1953_s12 = sphi %s1996_s12, %s2421_s12  }
   0x6   : > { %s2021_s18 = sadd.s32 1, %s1965_s15   ;;  %s26_s19 = sadd.s32 1, %s1961_s14 }
   0x7   : > { %s23_s20 = ssub.s32 %s1965_s15, %s2021_s18  ;;  %p33_p0 = scmp.ne.s32.totalorder %s1961_s14, %s1957_s13 }
   0x8   : > { %p24_p1 = scmp.eq.s32.totalorder %s23_s20, 0  ;;  %p34_p2 = scmp.eq.s32.totalorder %s1965_s15, 0 }
   0x9   : > { %p39_p3 = scmp.ne.s32.totalorder %s1957_s13, %s1953_s12  ;;  %p40_p4 = scmp.eq.s32.totalorder %s2017_s16, 0 }
   0xa   : > { %s2033_s21 = scalar_select %p24_p1, %s1961_s14, %s26_s19  }
   0xb   : > { %p2035_p5 = por %p34_p2, %p33_p0  ;;  %p2039_p6 = por %p40_p4, %p39_p3 }
   0xc   : > { %p105_p7 = scmp.eq.s32.totalorder %s2017_s16, 1  ;;  %p111_p8 = scmp.eq.s32.totalorder %s1490_s17, 1 }
   0xd   : > { %p1820_p10 = scmp.lt.s32.totalorder %s1965_s15, 2  ;;  %s137_s26 = sand.u32 1, %s1961_s14  }
   0xe   : > { %p2046_p11 = por %p105_p7, %p33_p0  ;;  %p2050_p12 = por %p111_p8, %p39_p3 }
   0xf   : > { %s1505_s27 = sshll.u32 %s1965_s15, 11  ;;  %s1493_s28 = sshll.u32 %s137_s26, 7 }
  0x10   : > { %s2415_s24 = scalar_select %p2046_p11, 1, 0 }
  0x11   : > { %s2416_s25 = scalar_select %p2050_p12, 1, 0 }
  0x12   : > { %s2059_s4 = scalar_lea.hbm %s2408_s0, %s1505_s27  ;;  %s141_s5 = scalar_lea.vmem [#allocation2], %s1493_s28 }
  0x13   : > { %s148_s6 = sshll.u32 %s141_s5, 4  ;;  %p2063_p13 = pnand %p1820_p10, %p2035_p5  ;;  %s2067_s6 = int_to_ptr.vmem [resolvable:$true] %s148_s6 }
  0x14   : > { %s2069_s8 = scalar_lea.sflag [#allocation3], %s137_s26  ;;  %s1869_s9 = scalar_lea.hbm %s2059_s4, 2048 }
  0x15   : > { %p1870_p0 = scmp.ne.s32.totalorder %s2059_s4, %s1869_s9  ;;  %p1871_p1 = pneg %p2063_p13 }
  0x16   : > { %s1874_s17 = scalar_lea.hbm %s2408_s0, 4096  ;;  %p1875_p4 = scmp.lt.u32.totalorder %s2059_s4, %s2408_s0 }
  0x17   : > { %p1872_p2 = pnand %p1871_p1, %p1870_p0  ;;  %p1876_p5 = scmp.lt.u32.totalorder %s1874_s17, %s1869_s9 }
  0x18   : > { %p1878_p8 = scmp.lt.u32.totalorder %s1869_s9, %s2059_s4 }
  0x19   : > { %p1873_p3 = pneg %p1872_p2  ;;  %p1877_p7 = por %p1876_p5, %p1875_p4 }
  0x1b   : > { %p1879_p10 = por %p1878_p8, %p1877_p7 }
  0x1d   : > { %p1880_p9 = pnand %p1879_p10, %p1873_p3 }
  0x1f   : > { %1883 = shalt.err (!%p1880_p9)
}
  0x20   : > { %s1884_s22 = scalar_lea.vmem %s2067_s6, 2048  ;;  %s1967_s26 = smov [#allocation2]  }
  0x21   : > { %p1885_p0 = scmp.ne.s32.totalorder %s2067_s6, %s1884_s22  ;;  %s1889_s27 = sshll.u32 %s1967_s26, 4  ;;  %s1890_s27 = int_to_ptr.vmem [resolvable:$false] %s1889_s27 }
  0x22   : > { %s1891_s28 = scalar_lea.vmem %s1890_s27, 4096  ;;  %p1892_p11 = scmp.lt.s32.totalorder %s2067_s6, %s1890_s27 }
  0x23   : > { %p1887_p2 = pnand %p1885_p0, %p1871_p1  ;;  %p1893_p4 = scmp.lt.s32.totalorder %s1891_s28, %s1884_s22 }
  0x25   : > { %p1888_p12 = pneg %p1887_p2  ;;  %p1894_p5 = por %p1893_p4, %p1892_p11 }
  0x27   : > { %p1895_p7 = pnand %p1894_p5, %p1888_p12 }
  0x29   : > { %1898 = shalt.err (!%p1895_p7)
}
  0x2a   : > { %s1968_s29 = smov 256   ;;  %s1969_s30 = smov 16  }
  0x2b   : > { %1815 = dma.hbm_to_vmem [thread:$0]  (!%p2063_p13), %s2059_s4, 2048, %s2067_s6, %s2069_s8, %s1968_s29, %s1968_s29, %s1969_s30  }
  0x2c   : > { %p1496_p9 = scmp.ge.s32.totalorder %s1965_s15, 1  ;;  %p156_p1 = scmp.lt.s32.totalorder %s1965_s15, 3 }
  0x2e   : > { %p157_p3 = pnand %p1496_p9, %p156_p1 }
  0x2f   : > { %s2100_s5 = sand.u32 (!%p157_p3), 1, %s1957_s13  }
  0x30   : > { %160 = sbr.rel (%p157_p3) target bundleno = 973 (0x3cd), region = 32  ;;  %s1497_s9 = sshll.u32 (!%p157_p3), %s2100_s5, 7 }
  0x31   : > { %s163_s10 = scalar_lea.sflag (!%p157_p3), [#allocation3], %s2100_s5  ;;  %s166_s11 = scalar_lea.vmem (!%p157_p3), [#allocation2], %s1497_s9 }
  0x37   : > { %1944 = dma.done.wait (%p2039_p6), %s163_s10, 2048  }
  0x38   : > { %1946 = vsyncadd (%p2039_p6), %s163_s10, 4294965248  ;;  %v2110_v0 = vld [vmem:[%s166_s11] sm:$0xff]  ;;  %v2112_v1 = vld [vmem:[%s166_s11 + $0x8] sm:$0xff]  ;;  %v1970_v34 = vmov 0.0|0.0   ;;  %vm1971_vm0 = vmmov 0   ;;  %v1972_v56 = vmov 0.0  }
  0x39   : > { %v2114_v2 = vld [vmem:[%s166_s11 + $0x20] sm:$0xff]  ;;  %v205_v3 = vadd.f32 %v2112_v1, %v2110_v0  ;;  %v2118_v4 = vld [vmem:[%s166_s11 + $0x28] sm:$0xff]  ;;  %v2120_v5 = vld [vmem:[%s166_s11 + $0x10] sm:$0xff]  ;;  %1741 = vmatprep.subr.bf16.mxu0 %v1970_v34  ;;  %1717 = vmatprep.subr.bf16.mxu1 %v1970_v34  ;;  %vm264_vm1 = vcmask 130112   ;;  %vm271_vm2 = vcmask 195712   ;;  %vm278_vm3 = vcmask 261312  }
  0x3a   : > { %v2122_v6 = vld [vmem:[%s166_s11 + $0x18] sm:$0xff]  ;;  %v211_v7 = vadd.f32 %v2118_v4, %v2114_v2  ;;  %v2126_v8 = vld [vmem:[%s166_s11 + $0x30] sm:$0xff]  ;;  %v2134_v12 = vld [vmem:[%s166_s11 + $0x40] sm:$0xff]  ;;  %1627 = vmatprep.mubr.msk.f32.mxu0 %vm1971_vm0, %v1972_v56  ;;  %1589 = vmatprep.mubr.msk.f32.mxu1 %vm1971_vm0, %v1972_v56  ;;  %vm285_vm4 = vcmask 326912   ;;  %vm292_vm5 = vcmask 392512   ;;  %vm299_vm6 = vcmask 458112  }
  0x3b   : > { %v2128_v9 = vld [vmem:[%s166_s11 + $0x38] sm:$0xff]  ;;  %206 = vadd.xlane.f32.xlu0 %v205_v3  ;;  %v208_v10 = vadd.f32 %v2122_v6, %v2120_v5  ;;  %v2136_v13 = vld [vmem:[%s166_s11 + $0x48] sm:$0xff]  ;;  %v2138_v14 = vld [vmem:[%s166_s11 + $0x50] sm:$0xff]  ;;  %vm306_vm7 = vcmask 523712   ;;  %vm308_vm8 = vcmask 523264   ;;  %vm880_vm9 = vcmask 1043456  }
  0x3c   : > { %212 = vadd.xlane.f32.xlu1 %v211_v7  ;;  %v214_v11 = vadd.f32 %v2128_v9, %v2126_v8  ;;  %v2140_v15 = vld [vmem:[%s166_s11 + $0x58] sm:$0xff]  ;;  %v217_v16 = vadd.f32 %v2136_v13, %v2134_v12  ;;  %v2146_v18 = vld [vmem:[%s166_s11 + $0x60] sm:$0xff]  ;;  %v2148_v19 = vld [vmem:[%s166_s11 + $0x68] sm:$0xff]  ;;  %vm876_vm11 = vcmask 31744   ;;  %s2327_s6 = scalar_lea.vmem [#allocation5], %s1497_s9  ;;  %s1506_s9 = sshll.u32 %s2017_s16, 11 }
  0x3d   : > { %v220_v17 = vadd.f32 %v2140_v15, %v2138_v14  ;;  %v2150_v20 = vld [vmem:[%s166_s11 + $0x70] sm:$0xff]  ;;  %v2152_v21 = vld [vmem:[%s166_s11 + $0x78] sm:$0xff]  ;;  %v223_v22 = vadd.f32 %v2148_v19, %v2146_v18  ;;  %v237_v24 = vld [vmem:[%s2409_s1] sm:$0xff]  ;;  %s1417_s7 = sshll.u32 %s2327_s6, 4  ;;  %s2358_s19 = scalar_lea.hbm %s2411_s3, %s1506_s9  ;;  %s2360_s7 = int_to_ptr.vmem [resolvable:$true] %s1417_s7 }
  0x3e   : > { %v226_v23 = vadd.f32 %v2152_v21, %v2150_v20  ;;  %v238_v25 = vld [vmem:[%s2409_s1 + $0x8] sm:$0xff]  ;;  %v312_v26 = vand.u32 4294901760, %v237_v24  ;;  %v239_v30 = vld [vmem:[%s2409_s1 + $0x10] sm:$0xff]  ;;  %v240_v31 = vld [vmem:[%s2409_s1 + $0x18] sm:$0xff]  ;;  %s1404_s16 = scalar_lea.sflag [#allocation4], %s2100_s5  ;;  %s1899_s20 = scalar_lea.vmem %s2360_s7, 2048 }
  0x3f   : > { %209 = vadd.xlane.f32.xlu0 %v208_v10  ;;  %v315_v27 = vand.u32 4294901760, %v238_v25  ;;  %v318_v33 = vand.u32 4294901760, %v239_v30  ;;  %v321_v35 = vand.u32 4294901760, %v240_v31  ;;  %v241_v38 = vld [vmem:[%s2409_s1 + $0x20] sm:$0xff]  ;;  %v242_v39 = vld [vmem:[%s2409_s1 + $0x28] sm:$0xff]  ;;  %v243_v46 = vld [vmem:[%s2409_s1 + $0x30] sm:$0xff]  ;;  %p1900_p6 = scmp.ne.s32.totalorder %s2360_s7, %s1899_s20 }
  0x40   : > { %215 = vadd.xlane.f32.xlu1 %v214_v11  ;;  %v2164_v28 = vsub.f32 %v237_v24, %v312_v26  ;;  %v324_v40 = vand.u32 4294901760, %v241_v38  ;;  %v327_v41 = vand.u32 4294901760, %v242_v39  ;;  %v244_v47 = vld [vmem:[%s2409_s1 + $0x38] sm:$0xff]  ;;  %v330_v48 = vand.u32 4294901760, %v243_v46  ;;  %p2418_p11 = scmp.ne.s32.totalorder %s2415_s24, 0  ;;  %s1973_s22 = smov [#allocation5]  }
  0x41   : > { %v2166_v29 = vsub.f32 %v238_v25, %v315_v27  ;;  %v2178_v36 = vsub.f32 %v239_v30, %v318_v33  ;;  %v2181_v37 = vsub.f32 %v240_v31, %v321_v35  ;;  %v2191_v43 = vpack.c.bf16 %v315_v27, %v312_v26  ;;  %s1903_s26 = sshll.u32 %s1973_s22, 4  ;;  %s1904_s26 = int_to_ptr.vmem [resolvable:$false] %s1903_s26 }
  0x42   : > { %v424_v44 = vsub.f32 %v241_v38, %v324_v40  ;;  %v431_v45 = vsub.f32 %v242_v39, %v327_v41  ;;  %v333_v50 = vand.u32 4294901760, %v244_v47  ;;  %v2202_v51 = vpack.c.bf16 %v321_v35, %v318_v33  ;;  %p1901_p12 = pnand %p1900_p6, %p2418_p11  ;;  %s1905_s27 = scalar_lea.vmem %s1904_s26, 4096 }
  0x43   : > { %218 = vadd.xlane.f32.xlu0 %v217_v16  ;;  %v1742_v32 = vpack.c.bf16 %v2166_v29, %v2164_v28  ;;  %v1745_v42 = vpack.c.bf16 %v2181_v37, %v2178_v36  ;;  %1719 = vmatpush3.bf16.msra.mxu1 %v2191_v43  ;;  %v438_v52 = vsub.f32 %v243_v46, %v330_v48  ;;  %v397_v57 = vand.u32 4294901760, %v2164_v28  ;;  %p1906_p8 = scmp.lt.s32.totalorder %s2360_s7, %s1904_s26  ;;  %p1907_p10 = scmp.lt.s32.totalorder %s1905_s27, %s1899_s20 }
  0x44   : > { %221 = vadd.xlane.f32.xlu1 %v220_v17  ;;  %v1748_v49 = vpack.c.bf16 %v431_v45, %v424_v44  ;;  %1720 = vmatprep.subr.bf16.mxu1 %v1970_v34  ;;  %v445_v53 = vsub.f32 %v244_v47, %v333_v50  ;;  %v2206_v54 = vpack.c.bf16 %v327_v41, %v324_v40  ;;  %v404_v58 = vand.u32 4294901760, %v2166_v29  ;;  %p1902_p13 = pneg %p1901_p12 }
  0x45   : > { %1743 = vmatpush3.bf16.msra.mxu0 %v1742_v32  ;;  %v2218_v59 = vpack.c.bf16 %v333_v50, %v330_v48  ;;  %v398_v60 = vsub.f32 %v2164_v28, %v397_v57  ;;  %v411_v3 = vand.u32 4294901760, %v2178_v36  ;;  %v418_v7 = vand.u32 4294901760, %v2181_v37  ;;  %p1908_p0 = por %p1907_p10, %p1906_p8 }
  0x46   : > { %1744 = vmatprep.subr.bf16.mxu0 %v1970_v34  ;;  %v1751_v55 = vpack.c.bf16 %v445_v53, %v438_v52  ;;  %v405_v61 = vsub.f32 %v2166_v29, %v404_v58  ;;  %v432_v24 = vand.u32 4294901760, %v431_v45  ;;  %v439_v30 = vand.u32 4294901760, %v438_v52 }
  0x47   : > { %224 = vadd.xlane.f32.xlu0 %v223_v22  ;;  %1722 = vmatpush3.bf16.msra.mxu1 %v2202_v51  ;;  %v399_v62 = vand.u32 4294901760, %v398_v60  ;;  %v412_v11 = vsub.f32 %v2178_v36, %v411_v3  ;;  %v419_v16 = vsub.f32 %v2181_v37, %v418_v7  ;;  %v446_v31 = vand.u32 4294901760, %v445_v53  ;;  %p1909_p2 = pnand %p1908_p0, %p1902_p13 }
  0x48   : > { %227 = vadd.xlane.f32.xlu1 %v226_v23  ;;  %1723 = vmatprep.subr.bf16.mxu1 %v1970_v34  ;;  %v406_v63 = vand.u32 4294901760, %v405_v61  ;;  %v425_v23 = vand.u32 4294901760, %v424_v44  ;;  %v433_v27 = vsub.f32 %v431_v45, %v432_v24  ;;  %v440_v33 = vsub.f32 %v438_v52, %v439_v30 }
  0x49   : > { %1746 = vmatpush3.bf16.msra.mxu0 %v1745_v42  ;;  %v413_v17 = vand.u32 4294901760, %v412_v11  ;;  %v420_v22 = vand.u32 4294901760, %v419_v16  ;;  %v447_v35 = vsub.f32 %v445_v53, %v446_v31  ;;  %v2234_v38 = vpack.c.bf16 %v404_v58, %v397_v57 }
  0x4a   : > { %1747 = vmatprep.subr.bf16.mxu0 %v1970_v34  ;;  %v2226_v10 = vpack.c.bf16 %v406_v63, %v399_v62  ;;  %v426_v26 = vsub.f32 %v424_v44, %v425_v23  ;;  %v434_v29 = vand.u32 4294901760, %v433_v27  ;;  %v441_v36 = vand.u32 4294901760, %v440_v33 }
  0x4b   : > { %1725 = vmatpush3.bf16.msra.mxu1 %v2206_v54  ;;  %v2230_v25 = vpack.c.bf16 %v420_v22, %v413_v17  ;;  %v448_v37 = vand.u32 4294901760, %v447_v35  ;;  %v2238_v40 = vpack.c.bf16 %v418_v7, %v411_v3  ;;  %v2240_v41 = vpack.c.bf16 %v432_v24, %v425_v23 }
  0x4c   : > { %1726 = vmatprep.subr.bf16.mxu1 %v1970_v34  ;;  %v427_v28 = vand.u32 4294901760, %v426_v26  ;;  %v2242_v42 = vpack.c.bf16 %v446_v31, %v439_v30  ;;  %v253_v44 = vlaneseq }
  0x4d   : > { %1749 = vmatpush3.bf16.msra.mxu0 %v1748_v49  ;;  %v2236_v39 = vpack.c.bf16 %v448_v37, %v441_v36 }
  0x4e   : > { %1750 = vmatprep.subr.bf16.mxu0 %v1970_v34  ;;  %v2232_v32 = vpack.c.bf16 %v434_v29, %v427_v28  ;;  %v254_v45 = vand.u32 127, %v253_v44  ;;  %v2244_v46 = vshrl.u32 %v253_v44, 7 }
  0x4f   : > { %1728 = vmatpush3.bf16.msra.mxu1 %v2218_v59 }
  0x50   : > { %1729 = vmatprep.subr.bf16.mxu1 %v1970_v34  ;;  %v259_v47 = vadd.s32 4294967288, %v254_v45  ;;  %v266_v49 = vadd.s32 4294967280, %v254_v45  ;;  %v273_v50 = vadd.s32 4294967272, %v254_v45  ;;  %v257_v53 = vsub.s32 %v254_v45, %v2244_v46 }
  0x51   : > { %1752 = vmatpush3.bf16.msra.mxu0 %v1751_v55  ;;  %v280_v58 = vadd.s32 4294967264, %v254_v45  ;;  %v287_v3 = vadd.s32 4294967256, %v254_v45  ;;  %v294_v24 = vadd.s32 4294967248, %v254_v45  ;;  %v301_v30 = vadd.s32 4294967240, %v254_v45 }
  0x52   : > { %1753 = vmatprep.subr.bf16.mxu0 %v1970_v34  ;;  %v262_v57 = vsub.s32 %v259_v47, %v2244_v46  ;;  %v269_v60 = vsub.s32 %v266_v49, %v2244_v46  ;;  %v276_v63 = vsub.s32 %v273_v50, %v2244_v46 }
  0x53   : > { %v283_v23 = vsub.s32 %v280_v58, %v2244_v46  ;;  %v290_v29 = vsub.s32 %v287_v3, %v2244_v46 }
  0xc8   : > { %v207_v48 = vpop.xlane.xlu0 %206 }
  0xc9   : > { %v213_v52 = vpop.xlane.xlu1 %212  ;;  %v229_v55 = vmul.f32 0.00390625, %v207_v48  ;;  %v297_v48 = vsub.s32 %v294_v24, %v2244_v46 }
  0xca   : > { %v231_v61 = vmul.f32 0.00390625, %v213_v52  ;;  %v304_v52 = vsub.s32 %v301_v30, %v2244_v46 }
  0xcb   : > { %v258_v17 = vrot.slane %v229_v55, %v257_v53 }
  0xcc   : > { %v210_v62 = vpop.xlane.xlu0 %209  ;;  %v270_v26 = vrot.slane %v231_v61, %v269_v60 }
  0xcd   : > { %v230_v7 = vmul.f32 0.00390625, %v210_v62  ;;  %v216_v11 = vpop.xlane.xlu1 %215 }
  0xce   : > { %v232_v16 = vmul.f32 0.00390625, %v216_v11 }
  0xcf   : > { %v263_v22 = vrot.slane %v230_v7, %v262_v57 }
  0xd0   : > { %v277_v27 = vrot.slane %v232_v16, %v276_v63  ;;  %v219_v28 = vpop.xlane.xlu0 %218 }
  0xd1   : > { %v265_v31 = vsel %vm264_vm1, %v263_v22, %v258_v17  ;;  %v233_v33 = vmul.f32 0.00390625, %v219_v28  ;;  %v222_v35 = vpop.xlane.xlu1 %221 }
  0xd2   : > { %v272_v36 = vsel %vm271_vm2, %v270_v26, %v265_v31  ;;  %v234_v37 = vmul.f32 0.00390625, %v222_v35 }
  0xd3   : > { %v279_v44 = vsel %vm278_vm3, %v277_v27, %v272_v36  ;;  %v284_v47 = vrot.slane %v233_v33, %v283_v23 }
  0xd4   : > { %v291_v49 = vrot.slane %v234_v37, %v290_v29  ;;  %v225_v50 = vpop.xlane.xlu0 %224 }
  0xd5   : > { %v286_v53 = vsel %vm285_vm4, %v284_v47, %v279_v44  ;;  %v235_v55 = vmul.f32 0.00390625, %v225_v50  ;;  %v228_v57 = vpop.xlane.xlu1 %227 }
  0xd6   : > { %v236_v45 = vmul.f32 0.00390625, %v228_v57  ;;  %v293_v60 = vsel %vm292_vm5, %v291_v49, %v286_v53 }
  0xd7   : > { %v298_v58 = vrot.slane %v235_v55, %v297_v48 }
  0xd8   : > { %v305_v61 = vrot.slane %v236_v45, %v304_v52 }
  0xd9   : > { %v300_v62 = vsel %vm299_vm6, %v298_v58, %v293_v60 }
  0xda   : > { %v307_v63 = vsel %vm306_vm7, %v305_v61, %v300_v62 }
  0xdb   : > { %v309_v3 = vsel %vm308_vm8, %v307_v63, 0 }
  0xdc   : > { %v384_v7 = vand.u32 4294901760, %v309_v3 }
  0xde   : > { %v385_v11 = vsub.f32 %v309_v3, %v384_v7 }
  0xe0   : > { %1628 = vmatmul.mubr.f32.vlgmr.msra.gmra.mrb[0].mxu0 %v385_v11  ;;  %v386_v16 = vand.u32 4294901760, %v385_v11 }
  0xe1   : > { %1755 = vmatpush3.bf16.msra.mxu0 %v2191_v43  ;;  %1646 = vmatprep.mubr.msk.f32.mxu0 %vm1971_vm0, %v1972_v56 }
  0xe2   : > { %1756 = vmatprep.subr.bf16.mxu0 %v1970_v34  ;;  %v387_v17 = vsub.f32 %v385_v11, %v386_v16 }
  0xe4   : > { %v388_v22 = vand.u32 4294901760, %v387_v17 }
  0xe5   : > { %1758 = vmatpush3.bf16.msra.mxu0 %v2202_v51 }
  0xe6   : > { %1590 = vmatmul.mubr.f32.vlgmr.msra.gmra.mrb[0].mxu1 %v388_v22  ;;  %1759 = vmatprep.subr.bf16.mxu0 %v1970_v34 }
  0xe7   : > { %1731 = vmatpush3.bf16.msra.mxu1 %v2226_v10  ;;  %1608 = vmatprep.mubr.msk.f32.mxu1 %vm1971_vm0, %v1972_v56 }
  0xe8   : > { %1732 = vmatprep.subr.bf16.mxu1 %v1970_v34 }
  0xe9   : > { %1761 = vmatpush3.bf16.msra.mxu0 %v2206_v54 }
  0xea   : > { %1762 = vmatprep.subr.bf16.mxu0 %v1970_v34 }
  0xeb   : > { %1734 = vmatpush3.bf16.msra.mxu1 %v2230_v25 }
  0xec   : > { %1735 = vmatprep.subr.bf16.mxu1 %v1970_v34 }
  0xed   : > { %1764 = vmatpush3.bf16.msra.mxu0 %v2218_v59 }
  0xee   : > { %1765 = vmatprep.subr.bf16.mxu0 %v1970_v34 }
  0xef   : > { %1737 = vmatpush3.bf16.msra.mxu1 %v2232_v32 }
  0xf0   : > { %1647 = vmatmul.mubr.f32.vlgmr.msra.gmra.mrb[0].mxu0 %v386_v16  ;;  %1738 = vmatprep.subr.bf16.mxu1 %v1970_v34 }
  0xf1   : > { %1767 = vmatpush3.bf16.msra.mxu0 %v2234_v38  ;;  %1665 = vmatprep.mubr.msk.f32.mxu0 %vm1971_vm0, %v1972_v56 }
  0xf2   : > { %1768 = vmatprep.subr.bf16.mxu0 %v1970_v34 }
  0xf3   : > { %1740 = vmatpush3.bf16.msra.mxu1 %v2236_v39 }
  0xf4   : > { %1687 = vmatprep.subr.mxu1 %v1972_v56 }
  0xf5   : > { %1770 = vmatpush3.bf16.msra.mxu0 %v2238_v40 }
  0xf6   : > { %1609 = vmatmul.mubr.f32.vlgmr.msra.gmra.mrb[0].mxu1 %v384_v7  ;;  %1771 = vmatprep.subr.bf16.mxu0 %v1970_v34 }
  0xf7   : > { %1689 = vmatprep.mubr.msk.f32.mxu1 %vm1971_vm0, %v1972_v56 }
  0xf9   : > { %1773 = vmatpush3.bf16.msra.mxu0 %v2240_v41 }
  0xfa   : > { %1774 = vmatprep.subr.bf16.mxu0 %v1970_v34 }
  0xfd   : > { %1776 = vmatpush3.bf16.msra.mxu0 %v2242_v42 }
  0xfe   : > { %1777 = vmatprep.subr.bf16.mxu0 %v1970_v34 }
 0x100   : > { %1666 = vmatmul.mubr.f32.vlgmr.msra.gmra.mrb[0].mxu0 %v384_v7 }
 0x101   : > { %1779 = vmatpush3.bf16.msra.mxu0 %v2191_v43  ;;  %1684 = vmatprep.mubr.msk.f32.mxu0 %vm1971_vm0, %v1972_v56  ;;  %v875_v43 = vld [vmem:[%s2410_s2] sm:$0xf] }
 0x102   : > { %1780 = vmatprep.subr.bf16.mxu0 %v1970_v34  ;;  %v882_v10 = vsel %vm880_vm9, %v875_v43, 0 }
 0x103   : > { %v2299_v25 = vand.u32 4294901760, %v882_v10 }
 0x105   : > { %1782 = vmatpush3.bf16.msra.mxu0 %v2202_v51  ;;  %1688 = vmatpush3.msra.mxu1 %v2299_v25  ;;  %v962_v55 = vsub.f32 %v882_v10, %v2299_v25 }
 0x106   : > { %1783 = vmatprep.subr.bf16.mxu0 %v1970_v34  ;;  %1692 = vmatprep.subr.mxu1 %v1972_v56 }
 0x107   : > { %v963_v58 = vand.u32 4294901760, %v962_v55 }
 0x109   : > { %1785 = vmatpush3.bf16.msra.mxu0 %v2206_v54  ;;  %v964_v62 = vsub.f32 %v962_v55, %v963_v58 }
 0x10a   : > { %1786 = vmatprep.subr.bf16.mxu0 %v1970_v34 }
 0x10d   : > { %1788 = vmatpush3.bf16.msra.mxu0 %v2218_v59 }
 0x110   : > { %1685 = vmatmul.mubr.f32.vlgmr.msra.gmra.mrb[0].mxu0 %v384_v7  ;;  %v965_v7 = vand.u32 4294901760, %v964_v62 }
 0x1c9   : > { %v501_v51 = vpop.f32.mrb[0].mxu1 }
 0x1ca   : > { %v1610_v32 = vpop.f32.mrb[1].mxu1 }
 0x1e3   : > { %v844_v54 = vpop.f32.mrb[0].mxu0 }
 0x1e4   : > { %v1789_v38 = vadd.f32 %v844_v54, %v501_v51  ;;  %v1686_v34 = vpop.f32.mrb[1].mxu0  ;;  %v1338_v51 = vsub.s32 0, %v2244_v46 }
 0x1e6   : > { %v849_v39 = vmul.f32 0.70710677, %v1789_v38  ;;  %v848_v52 = vmul.f32 0.5, %v1789_v38 }
 0x1e8   : > { %v850_v59 = vand.u32 2147483647, %v849_v39  ;;  %vm870_vm10 = vcmp.lt.f32.partialorder %v849_v39, 0.0 }
 0x1ea   : > { %v851_v40 = vmul.f32 0.3275911, %v850_v59  ;;  %v864_v42 = vmul.f32 %v850_v59, %v850_v59 }
 0x1ec   : > { %v852_v41 = vadd.f32 1.0, %v851_v40  ;;  %v865_v24 = vsub.f32 0.0, %v864_v42 }
 0x1ee   : > { %1861 = vrcp.f32 %v852_v41  ;;  %v866_v28 = vmul.f32 1.442695, %v865_v24 }
 0x1f0   : > { %1863 = vpow2.f32 %v866_v28 }
 0x1f8   : > { %v1862_v23 = vpop.eup %1861 }
 0x1f9   : > { %v855_v26 = vmul.f32 1.0614054, %v1862_v23 }
 0x1fa   : > { %v1864_v44 = vpop.eup %1863 }
 0x1fb   : > { %v856_v27 = vadd.f32 -1.4531521, %v855_v26 }
 0x1fd   : > { %v857_v29 = vmul.f32 %v1862_v23, %v856_v27 }
 0x1ff   : > { %v858_v30 = vadd.f32 1.4214138, %v857_v29 }
 0x201   : > { %v859_v31 = vmul.f32 %v1862_v23, %v858_v30 }
 0x203   : > { %v860_v33 = vadd.f32 -0.28449672, %v859_v31 }
 0x205   : > { %v861_v35 = vmul.f32 %v1862_v23, %v860_v33 }
 0x207   : > { %v862_v36 = vadd.f32 0.2548296, %v861_v35 }
 0x209   : > { %v863_v37 = vmul.f32 %v1862_v23, %v862_v36 }
 0x20b   : > { %v868_v47 = vmul.f32 %v1864_v44, %v863_v37 }
 0x20d   : > { %v869_v48 = vsub.f32 1.0, %v868_v47 }
 0x20f   : > { %v871_v49 = vsub.f32 0.0, %v869_v48 }
 0x211   : > { %v872_v50 = vsel %vm870_vm10, %v871_v49, %v869_v48 }
 0x212   : > { %v873_v53 = vadd.f32 1.0, %v872_v50 }
 0x214   : > { %v874_v57 = vmul.f32 %v873_v53, %v848_v52 }
 0x216   : > { %v878_v45 = vsel %vm876_vm11, %v874_v57, 0 }
 0x217   : > { %v950_v60 = vand.u32 4294901760, %v878_v45 }
 0x219   : > { %v951_v61 = vsub.f32 %v878_v45, %v950_v60 }
 0x21b   : > { %v952_v63 = vand.u32 4294901760, %v951_v61 }
 0x21d   : > { %v953_v3 = vsub.f32 %v951_v61, %v952_v63 }
 0x21f   : > { %v954_v11 = vand.u32 4294901760, %v953_v3 }
 0x221   : > { %1690 = vmatmul.mubr.f32.vlgmr.msra.gmra.mrb[2].mxu1 %v954_v11 }
 0x222   : > { %1693 = vmatpush3.msra.mxu1 %v965_v7  ;;  %1694 = vmatprep.mubr.msk.f32.mxu1 %vm1971_vm0, %v1972_v56 }
 0x223   : > { %1697 = vmatprep.subr.mxu1 %v1972_v56 }
 0x229   : > { %1695 = vmatmul.mubr.f32.vlgmr.msra.gmra.mrb[2].mxu1 %v950_v60 }
 0x22a   : > { %1698 = vmatpush3.msra.mxu1 %v962_v55  ;;  %1699 = vmatprep.mubr.msk.f32.mxu1 %vm1971_vm0, %v1972_v56 }
 0x22b   : > { %1702 = vmatprep.subr.mxu1 %v1972_v56 }
 0x231   : > { %1700 = vmatmul.mubr.f32.vlgmr.msra.gmra.mrb[2].mxu1 %v951_v61 }
 0x232   : > { %1703 = vmatpush3.msra.mxu1 %v2299_v25  ;;  %1704 = vmatprep.mubr.msk.f32.mxu1 %vm1971_vm0, %v1972_v56 }
 0x233   : > { %1707 = vmatprep.subr.mxu1 %v1972_v56 }
 0x239   : > { %1705 = vmatmul.mubr.f32.vlgmr.msra.gmra.mrb[2].mxu1 %v952_v63 }
 0x23a   : > { %1708 = vmatpush3.msra.mxu1 %v963_v58  ;;  %1709 = vmatprep.mubr.msk.f32.mxu1 %vm1971_vm0, %v1972_v56 }
 0x23b   : > { %1712 = vmatprep.subr.mxu1 %v1972_v56 }
 0x241   : > { %1710 = vmatmul.mubr.f32.vlgmr.msra.gmra.mrb[2].mxu1 %v950_v60 }
 0x242   : > { %1713 = vmatpush3.msra.mxu1 %v2299_v25  ;;  %1714 = vmatprep.mubr.msk.f32.mxu1 %vm1971_vm0, %v1972_v56 }
 0x249   : > { %1715 = vmatmul.mubr.f32.vlgmr.msra.gmra.mrb[2].mxu1 %v950_v60 }
 0x31c   : > { %v1326_v16 = vpop.f32.mrb[2].mxu1 }
 0x31d   : > { %v1499_v17 = vmul.f32 -1.442695, %v1326_v16  ;;  %v1716_v22 = vpop.f32.mrb[3].mxu1 }
 0x31f   : > { %1865 = vpow2.f32 %v1499_v17 }
 0x329   : > { %v1866_v43 = vpop.eup %1865 }
 0x32a   : > { %v1333_v10 = vadd.f32 1.0, %v1866_v43 }
 0x32c   : > { %1867 = vrcp.f32 %v1333_v10 }
 0x336   : > { %v1868_v32 = vpop.eup %1867 }
 0x337   : > { %v1339_v54 = vrot.slane %v1868_v32, %v1338_v51 }
 0x339   : > { %1345 = vbcast.lane.b32.xlu1 %v1339_v54, 264  ;;  %1341 = vbcast.lane.b32.xlu0 %v1339_v54, 256 }
 0x33d   : > { %1349 = vbcast.lane.b32.xlu1 %v1339_v54, 272  ;;  %1357 = vbcast.lane.b32.xlu0 %v1339_v54, 288 }
 0x341   : > { %1353 = vbcast.lane.b32.xlu1 %v1339_v54, 280  ;;  %1365 = vbcast.lane.b32.xlu0 %v1339_v54, 304 }
 0x345   : > { %1361 = vbcast.lane.b32.xlu1 %v1339_v54, 296 }
 0x349   : > { %1369 = vbcast.lane.b32.xlu1 %v1339_v54, 312 }
 0x3ab   : > { %v1346_v56 = vpop.permute.xlu1 %1345  ;;  %v1342_v25 = vpop.permute.xlu0 %1341 }
 0x3ac   : > { %v1373_v38 = vmul.f32 %v1346_v56, %v2120_v5  ;;  %v1374_v34 = vmul.f32 %v1346_v56, %v2122_v6  ;;  %v1371_v39 = vmul.f32 %v1342_v25, %v2110_v0  ;;  %v1372_v46 = vmul.f32 %v1342_v25, %v2112_v1 }
 0x3ae   : > { %1389 = vst [vmem:[%s2327_s6 + $0x10] sm:$0xff] %v1373_v38  ;;  %1390 = vst [vmem:[%s2327_s6 + $0x18] sm:$0xff] %v1374_v34 }
 0x3af   : > { %1387 = vst [vmem:[%s2327_s6] sm:$0xff] %v1371_v39  ;;  %1388 = vst [vmem:[%s2327_s6 + $0x8] sm:$0xff] %v1372_v46  ;;  %v1350_v5 = vpop.permute.xlu1 %1349  ;;  %v1358_v0 = vpop.permute.xlu0 %1357 }
 0x3b0   : > { %v1375_v1 = vmul.f32 %v1350_v5, %v2114_v2  ;;  %v1376_v6 = vmul.f32 %v1350_v5, %v2118_v4  ;;  %v1379_v59 = vmul.f32 %v1358_v0, %v2134_v12  ;;  %v1380_v40 = vmul.f32 %v1358_v0, %v2136_v13 }
 0x3b2   : > { %1391 = vst [vmem:[%s2327_s6 + $0x20] sm:$0xff] %v1375_v1  ;;  %1392 = vst [vmem:[%s2327_s6 + $0x28] sm:$0xff] %v1376_v6 }
 0x3b3   : > { %1395 = vst [vmem:[%s2327_s6 + $0x40] sm:$0xff] %v1379_v59  ;;  %1396 = vst [vmem:[%s2327_s6 + $0x48] sm:$0xff] %v1380_v40  ;;  %v1354_v41 = vpop.permute.xlu1 %1353  ;;  %v1366_v42 = vpop.permute.xlu0 %1365 }
 0x3b4   : > { %v1377_v2 = vmul.f32 %v1354_v41, %v2126_v8  ;;  %v1378_v23 = vmul.f32 %v1354_v41, %v2128_v9  ;;  %v1383_v4 = vmul.f32 %v1366_v42, %v2146_v18  ;;  %v1384_v12 = vmul.f32 %v1366_v42, %v2148_v19 }
 0x3b6   : > { %1393 = vst [vmem:[%s2327_s6 + $0x30] sm:$0xff] %v1377_v2  ;;  %1394 = vst [vmem:[%s2327_s6 + $0x38] sm:$0xff] %v1378_v23 }
 0x3b7   : > { %1399 = vst [vmem:[%s2327_s6 + $0x60] sm:$0xff] %v1383_v4  ;;  %1400 = vst [vmem:[%s2327_s6 + $0x68] sm:$0xff] %v1384_v12  ;;  %v1362_v13 = vpop.permute.xlu1 %1361 }
 0x3b8   : > { %v1381_v24 = vmul.f32 %v1362_v13, %v2138_v14  ;;  %v1382_v26 = vmul.f32 %v1362_v13, %v2140_v15 }
 0x3ba   : > { %1397 = vst [vmem:[%s2327_s6 + $0x50] sm:$0xff] %v1381_v24  ;;  %1398 = vst [vmem:[%s2327_s6 + $0x58] sm:$0xff] %v1382_v26 }
 0x3bb   : > { %v1370_v8 = vpop.permute.xlu1 %1369 }
 0x3bc   : > { %v1385_v9 = vmul.f32 %v1370_v8, %v2150_v20  ;;  %v1386_v14 = vmul.f32 %v1370_v8, %v2152_v21 }
 0x3be   : > { %1401 = vst [vmem:[%s2327_s6 + $0x70] sm:$0xff] %v1385_v9  ;;  %1402 = vst [vmem:[%s2327_s6 + $0x78] sm:$0xff] %v1386_v14 }
 0x3bf   : > { %1912 = shalt.err (!%p1909_p2)
}
 0x3c0   : > { %s1913_s28 = scalar_lea.hbm %s2358_s19, 2048  ;;  %s1917_s10 = scalar_lea.hbm %s2411_s3, 4096 }
 0x3c1   : > { %p1914_p4 = scmp.ne.s32.totalorder %s2358_s19, %s1913_s28  ;;  %p1918_p9 = scmp.lt.u32.totalorder %s2358_s19, %s2411_s3 }
 0x3c2   : > { %p1919_p1 = scmp.lt.u32.totalorder %s1917_s10, %s1913_s28  ;;  %p1921_p6 = scmp.lt.u32.totalorder %s1913_s28, %s2358_s19 }
 0x3c3   : > { %p1915_p5 = pnand %p1914_p4, %p2418_p11 }
 0x3c4   : > { %p1920_p3 = por %p1919_p1, %p1918_p9 }
 0x3c5   : > { %p1916_p7 = pneg %p1915_p5 }
 0x3c6   : > { %p1922_p12 = por %p1921_p6, %p1920_p3 }
 0x3c8   : > { %p1923_p13 = pnand %p1922_p12, %p1916_p7 }
 0x3ca   : > { %1926 = shalt.err (!%p1923_p13)
}
 0x3cb   : > { %s1974_s4 = smov 256   ;;  %s1975_s6 = smov 16  }
 0x3cc   : > { %1810 = dma.vmem_to_hbm [thread:$0]  (%p2418_p11), %s2360_s7, 2048, %s2358_s19, %s1404_s16, %s1974_s4, %s1974_s4, %s1975_s6  }
 0x3cd PF: > { %s1432_s9 = sand.u32 1, %s1953_s12   ;;  %p2419_p8 = scmp.ne.s32.totalorder %s2416_s25, 0 }
 0x3ce   : > { %p2420_p10 = scmp.ge.s32.totalorder %s1965_s15, 2  ;;  %s1433_s8 = scalar_lea.sflag [#allocation4], %s1432_s9 }
 0x3d0   : > { %p1817_p0 = pnand %p2420_p10, %p2419_p8 }
 0x3d2   : > { %1948 = dma.done.wait (!%p1817_p0), %s1433_s8, 2048  }
 0x3d3   : > { %1950 = vsyncadd (!%p1817_p0), %s1433_s8, 4294965248  ;;  %p16_p2 = scmp.ge.s32.totalorder %s2021_s18, 4   ;;  %s2421_s12 = smov %s1957_s13 }
 0x3d4   : > { %s2422_s13 = smov %s1961_s14  ;;  %s2423_s14 = smov %s2033_s21 }
 0x3d5   : > { %s2424_s15 = smov %s2021_s18  ;;  %18 = sbr.rel (!%p16_p2) target bundleno = 5 (0x5), region = 77 }
 0x3dc   :  { %1438 = vsyncpa [#allocation3], 1 }
 0x3dd   :  { %1440 = vsyncpa [#allocation3 + $0x1], 1 }
 0x3de   :  { %1441 = vsyncpa [#allocation4], 1 }
 0x3df   :  { %1443 = vsyncpa [#allocation4 + $0x1], 1 }

</bundles_post_ra>
